<compile_context>
chip_gen: v7x
topology: tpu7x:2x2x1
jax: 0.10.0
libtpu: 0.0.40
codegen_flags: <defaults>
</compile_context>

<pallas_src>
import jax
import jax.numpy as jnp
from jax.experimental import pallas as pl
from jax.experimental.pallas import tpu as pltpu


DEFAULT_BLOCK_M = 8192  # batch tile; x block ~1.3 MiB f32 -> per-step overhead <10%


def _round_up(n, m):
    return (n + m - 1) // m * m


def _mlp_kernel(x_ref, w1_ref, b1_ref, w2_ref, b2_ref, w3_ref, b3_ref, o_ref):
    # One (bm, 40) f32 batch tile per grid step; all three Linear(+ReLU) fused.
    x = x_ref[...].astype(jnp.bfloat16)                                # in-kernel cast
    h1 = jnp.dot(x, w1_ref[...], preferred_element_type=jnp.float32) + b1_ref[...]
    h1 = jnp.maximum(h1, 0.0)                                          # ReLU (f32)
    h2 = jnp.dot(h1.astype(jnp.bfloat16), w2_ref[...],
                 preferred_element_type=jnp.float32) + b2_ref[...]
    h2 = jnp.maximum(h2, 0.0)                                          # ReLU (f32)
    logits = jnp.dot(h2.astype(jnp.bfloat16), w3_ref[...],
                     preferred_element_type=jnp.float32) + b3_ref[...]
    o_ref[...] = logits.astype(o_ref.dtype)                            # (bm, 2) f32


def _choose_bm(batch, block_m):
    # Multiple-of-8 batch tile. Aim for >=2 grid steps when batch is big enough
    # (v7x megacore sharding) while keeping tail waste small (bm ~ cdiv(B, steps)).
    n_steps = pl.cdiv(batch, block_m)
    if batch >= 16:
        n_steps = max(n_steps, 2)
    bm = _round_up(pl.cdiv(batch, n_steps), 8)
    return max(8, min(bm, _round_up(batch, 8)))


def voice_classifier_forward(x, params, *, block_m=DEFAULT_BLOCK_M):
    """x: (B, input_dim) f32. params: dict of w1,b1,w2,b2,w3,b3 (weights (in, out))."""
    B, D = x.shape
    out_dim = params["w3"].shape[1]                                    # 2

    # Tiny weights: bf16 operands for the MXU; f32 biases for the VPU add.
    w1 = params["w1"].astype(jnp.bfloat16)
    w2 = params["w2"].astype(jnp.bfloat16)
    w3 = params["w3"].astype(jnp.bfloat16)
    b1 = params["b1"].astype(jnp.float32)
    b2 = params["b2"].astype(jnp.float32)
    b3 = params["b3"].astype(jnp.float32)

    bm = _choose_bm(B, block_m)
    grid = (pl.cdiv(B, bm),)   # partial last tile: OOB reads unused, OOB writes dropped

    def const(a):
        return pl.BlockSpec(a.shape, lambda i: (0,) * a.ndim)

    flops = 2 * B * (D * 64 + 64 * 32 + 32 * out_dim)
    bytes_accessed = (x.size * x.dtype.itemsize + B * out_dim * 4
                      + (w1.size + w2.size + w3.size) * 2
                      + (b1.size + b2.size + b3.size) * 4)

    out = pl.pallas_call(
        _mlp_kernel,
        out_shape=jax.ShapeDtypeStruct((B, out_dim), jnp.float32),
        grid_spec=pl.GridSpec(
            grid=grid,
            in_specs=[
                pl.BlockSpec((bm, D), lambda i: (i, 0)),   # x: tiled over batch (f32)
                const(w1), const(b1),                      # weights: VMEM-resident
                const(w2), const(b2),
                const(w3), const(b3),
            ],
            # Narrow output block: last dim equals the full array dim (=2), so the
            # (8,128) rule passes; writeback is 8 B/row instead of 512 B/row.
            out_specs=pl.BlockSpec((bm, out_dim), lambda i: (i, 0)),
        ),
        compiler_params=pltpu.CompilerParams(
            dimension_semantics=("parallel",),   # shard batch steps across TCs on v7x
        ),
        cost_estimate=pl.CostEstimate(
            flops=flops, transcendentals=0, bytes_accessed=bytes_accessed),
    )(x, w1, b1, w2, b2, w3, b3)

    return out


def init_params(key, input_dim=40):
    """Deterministic init matching nn.Linear shapes (stored transposed: (in, out))."""
    k1, k2, k3, k4, k5, k6 = jax.random.split(key, 6)

    def linear(kw, kb, fan_in, fan_out):
        # PyTorch nn.Linear default: U(-1/sqrt(fan_in), 1/sqrt(fan_in))
        bound = 1.0 / jnp.sqrt(float(fan_in))
        w = jax.random.uniform(kw, (fan_in, fan_out), jnp.float32, -bound, bound)
        b = jax.random.uniform(kb, (1, fan_out), jnp.float32, -bound, bound)
        return w, b

    w1, b1 = linear(k1, k2, input_dim, 64)
    w2, b2 = linear(k3, k4, 64, 32)
    w3, b3 = linear(k5, k6, 32, 2)
    return {"w1": w1, "b1": b1, "w2": w2, "b2": b2, "w3": w3, "b3": b3}


def reference_forward_f32(x, p):
    h1 = jnp.maximum(x @ p["w1"] + p["b1"], 0.0)
    h2 = jnp.maximum(h1 @ p["w2"] + p["b2"], 0.0)
    return h2 @ p["w3"] + p["b3"]


def reference_forward_bf16(x, p):
    # Mimics the kernel's precision: bf16 matmul operands, f32 accumulation,
    # f32 bias add + ReLU.
    bf = jnp.bfloat16
    h1 = jnp.maximum(
        jnp.dot(x.astype(bf), p["w1"].astype(bf),
                preferred_element_type=jnp.float32) + p["b1"], 0.0)
    h2 = jnp.maximum(
        jnp.dot(h1.astype(bf), p["w2"].astype(bf),
                preferred_element_type=jnp.float32) + p["b2"], 0.0)
    return (jnp.dot(h2.astype(bf), p["w3"].astype(bf),
                    preferred_element_type=jnp.float32) + p["b3"])


if __name__ == "__main__":
    key = jax.random.PRNGKey(0)
    k_param, k_x = jax.random.split(key)

    input_dim = 40
    batch = 8
    params = init_params(k_param, input_dim=input_dim)
    x = jax.random.normal(k_x, (batch, input_dim), dtype=jnp.float32)

    out = voice_classifier_forward(x, params)
    out = jax.block_until_ready(out)
    assert out.shape == (batch, 2), out.shape

    ref_bf16 = reference_forward_bf16(x, params)    # same precision as the kernel
    ref_f32 = reference_forward_f32(x, params)      # full-f32 PyTorch-equivalent math
    assert jnp.allclose(out, ref_bf16, atol=1e-3, rtol=1e-3), "mismatch vs bf16 reference"
    assert jnp.allclose(out, ref_f32, atol=5e-2, rtol=5e-2), "mismatch vs f32 reference"

    print("KERNEL_OK")
</pallas_src>

<mosaic_0001>
module attributes {stable_mosaic.version = 11 : i64} {
  func.func @_mlp_kernel(%arg0: i32, %arg1: memref<8x40xf32, #tpu.memory_space<vmem>>, %arg2: memref<40x64xbf16, #tpu.memory_space<vmem>>, %arg3: memref<1x64xf32, #tpu.memory_space<vmem>>, %arg4: memref<64x32xbf16, #tpu.memory_space<vmem>>, %arg5: memref<1x32xf32, #tpu.memory_space<vmem>>, %arg6: memref<32x2xbf16, #tpu.memory_space<vmem>>, %arg7: memref<1x2xf32, #tpu.memory_space<vmem>>, %arg8: memref<8x2xf32, #tpu.memory_space<vmem>>) attributes {dimension_semantics = [#tpu.dimension_semantics<parallel>], iteration_bounds = array<i64: 1>, scalar_prefetch = 0 : i64, scratch_operands = 0 : i64, tpu.core_type = #tpu.core_type<tc>, window_params = [{transform_indices = @transform_0, window_bounds = array<i64: 8, 40>}, {pipeline_mode = #tpu.pipeline_mode<synchronous>, transform_indices = @transform_1, window_bounds = array<i64: 40, 64>}, {pipeline_mode = #tpu.pipeline_mode<synchronous>, transform_indices = @transform_2, window_bounds = array<i64: 1, 64>}, {pipeline_mode = #tpu.pipeline_mode<synchronous>, transform_indices = @transform_3, window_bounds = array<i64: 64, 32>}, {pipeline_mode = #tpu.pipeline_mode<synchronous>, transform_indices = @transform_4, window_bounds = array<i64: 1, 32>}, {pipeline_mode = #tpu.pipeline_mode<synchronous>, transform_indices = @transform_5, window_bounds = array<i64: 32, 2>}, {pipeline_mode = #tpu.pipeline_mode<synchronous>, transform_indices = @transform_6, window_bounds = array<i64: 1, 2>}, {transform_indices = @transform_7, window_bounds = array<i64: 8, 2>}]} {
    %c0 = arith.constant 0 : index
    %c0_0 = arith.constant 0 : index
    %0 = vector.load %arg1[%c0, %c0_0] : memref<8x40xf32, #tpu.memory_space<vmem>>, vector<8x40xf32>
    %1 = arith.truncf %0 : vector<8x40xf32> to vector<8x40xbf16>
    %c0_1 = arith.constant 0 : index
    %c0_2 = arith.constant 0 : index
    %2 = vector.load %arg2[%c0_1, %c0_2] : memref<40x64xbf16, #tpu.memory_space<vmem>>, vector<40x64xbf16>
    %cst = arith.constant dense<0.000000e+00> : vector<8x64xf32>
    %3 = tpu.matmul %1, %2, %cst {dimension_numbers = #tpu.dot_dimension_numbers<[1], [0], [0], [1], [0, 0, 1, 1], [], []>} : vector<8x40xbf16>, vector<40x64xbf16>, vector<8x64xf32> -> vector<8x64xf32>
    %c0_3 = arith.constant 0 : index
    %c0_4 = arith.constant 0 : index
    %4 = vector.load %arg3[%c0_3, %c0_4] : memref<1x64xf32, #tpu.memory_space<vmem>>, vector<1x64xf32>
    %5 = vector.broadcast %4 : vector<1x64xf32> to vector<8x64xf32>
    %6 = arith.addf %3, %5 : vector<8x64xf32>
    %cst_5 = arith.constant 0.000000e+00 : f32
    %7 = vector.broadcast %cst_5 : f32 to vector<8x64xf32>
    %8 = arith.maximumf %6, %7 : vector<8x64xf32>
    %9 = arith.truncf %8 : vector<8x64xf32> to vector<8x64xbf16>
    %c0_6 = arith.constant 0 : index
    %c0_7 = arith.constant 0 : index
    %10 = vector.load %arg4[%c0_6, %c0_7] : memref<64x32xbf16, #tpu.memory_space<vmem>>, vector<64x32xbf16>
    %cst_8 = arith.constant dense<0.000000e+00> : vector<8x32xf32>
    %11 = tpu.matmul %9, %10, %cst_8 {dimension_numbers = #tpu.dot_dimension_numbers<[1], [0], [0], [1], [0, 0, 1, 1], [], []>} : vector<8x64xbf16>, vector<64x32xbf16>, vector<8x32xf32> -> vector<8x32xf32>
    %c0_9 = arith.constant 0 : index
    %c0_10 = arith.constant 0 : index
    %12 = vector.load %arg5[%c0_9, %c0_10] : memref<1x32xf32, #tpu.memory_space<vmem>>, vector<1x32xf32>
    %13 = vector.broadcast %12 : vector<1x32xf32> to vector<8x32xf32>
    %14 = arith.addf %11, %13 : vector<8x32xf32>
    %cst_11 = arith.constant 0.000000e+00 : f32
    %15 = vector.broadcast %cst_11 : f32 to vector<8x32xf32>
    %16 = arith.maximumf %14, %15 : vector<8x32xf32>
    %17 = arith.truncf %16 : vector<8x32xf32> to vector<8x32xbf16>
    %c0_12 = arith.constant 0 : index
    %c0_13 = arith.constant 0 : index
    %18 = vector.load %arg6[%c0_12, %c0_13] : memref<32x2xbf16, #tpu.memory_space<vmem>>, vector<32x2xbf16>
    %cst_14 = arith.constant dense<0.000000e+00> : vector<8x2xf32>
    %19 = tpu.matmul %17, %18, %cst_14 {dimension_numbers = #tpu.dot_dimension_numbers<[1], [0], [0], [1], [0, 0, 1, 1], [], []>} : vector<8x32xbf16>, vector<32x2xbf16>, vector<8x2xf32> -> vector<8x2xf32>
    %c0_15 = arith.constant 0 : index
    %c0_16 = arith.constant 0 : index
    %20 = vector.load %arg7[%c0_15, %c0_16] : memref<1x2xf32, #tpu.memory_space<vmem>>, vector<1x2xf32>
    %21 = vector.broadcast %20 : vector<1x2xf32> to vector<8x2xf32>
    %22 = arith.addf %19, %21 : vector<8x2xf32>
    %c0_17 = arith.constant 0 : index
    %c0_18 = arith.constant 0 : index
    %23 = vector.load %arg8[%c0_17, %c0_18] : memref<8x2xf32, #tpu.memory_space<vmem>>, vector<8x2xf32>
    tpu.vector_store %arg8[%c0_17, %c0_18], %22 {strides = array<i32>} : memref<8x2xf32, #tpu.memory_space<vmem>>, vector<8x2xf32>,
    return
  }
  func.func @transform_0(%arg0: i32) -> (i32, i32) {
    %c0_i32 = arith.constant 0 : i32
    %c0_i32_0 = arith.constant 0 : i32
    return %arg0, %c0_i32 : i32, i32
  }
  func.func @transform_1(%arg0: i32) -> (i32, i32) {
    %c0_i32 = arith.constant 0 : i32
    %c0_i32_0 = arith.constant 0 : i32
    %c0_i32_1 = arith.constant 0 : i32
    return %c0_i32, %c0_i32_0 : i32, i32
  }
  func.func @transform_2(%arg0: i32) -> (i32, i32) {
    %c0_i32 = arith.constant 0 : i32
    %c0_i32_0 = arith.constant 0 : i32
    %c0_i32_1 = arith.constant 0 : i32
    return %c0_i32, %c0_i32_0 : i32, i32
  }
  func.func @transform_3(%arg0: i32) -> (i32, i32) {
    %c0_i32 = arith.constant 0 : i32
    %c0_i32_0 = arith.constant 0 : i32
    %c0_i32_1 = arith.constant 0 : i32
    return %c0_i32, %c0_i32_0 : i32, i32
  }
  func.func @transform_4(%arg0: i32) -> (i32, i32) {
    %c0_i32 = arith.constant 0 : i32
    %c0_i32_0 = arith.constant 0 : i32
    %c0_i32_1 = arith.constant 0 : i32
    return %c0_i32, %c0_i32_0 : i32, i32
  }
  func.func @transform_5(%arg0: i32) -> (i32, i32) {
    %c0_i32 = arith.constant 0 : i32
    %c0_i32_0 = arith.constant 0 : i32
    %c0_i32_1 = arith.constant 0 : i32
    return %c0_i32, %c0_i32_0 : i32, i32
  }
  func.func @transform_6(%arg0: i32) -> (i32, i32) {
    %c0_i32 = arith.constant 0 : i32
    %c0_i32_0 = arith.constant 0 : i32
    %c0_i32_1 = arith.constant 0 : i32
    return %c0_i32, %c0_i32_0 : i32, i32
  }
  func.func @transform_7(%arg0: i32) -> (i32, i32) {
    %c0_i32 = arith.constant 0 : i32
    %c0_i32_0 = arith.constant 0 : i32
    return %arg0, %c0_i32 : i32, i32
  }
}

</mosaic_0001>

<bundles_post_ra>
// kernel: tpu_custom_call.1
= control target key start
LH: loop header
LB: loop body
LE: loop exit
PB: predicated region body
PF: predicated region fallthrough
CT: control target
= control target key end

     0   :  { %v332_v0 = vmov 0.0   ;;  %vm333_vm0 = vmmov 0   ;;  %vm60_vm1 = vcmask 1043456   ;;  %vm56_vm2 = vcmask 326656   ;;  %s419_s1 = inlined_call_operand.vmem [shape: bf16[40,64], index: 1, kind: input, shape index: {}]   ;;  %s420_s3 = inlined_call_operand.vmem [shape: bf16[64,32], index: 3, kind: input, shape index: {}]   ;;  %s421_s0 = inlined_call_operand.vmem [shape: f32[8,40], index: 0, kind: input, shape index: {}]   ;;  %s422_s5 = inlined_call_operand.vmem [shape: bf16[32,2], index: 5, kind: input, shape index: {}]   ;;  %s423_s2 = inlined_call_operand.vmem [shape: f32[1,64], index: 2, kind: input, shape index: {}]   ;;  %s424_s4 = inlined_call_operand.vmem [shape: f32[1,32], index: 4, kind: input, shape index: {}]   ;;  %s425_s6 = inlined_call_operand.vmem [shape: f32[1,2], index: 6, kind: input, shape index: {}]   ;;  %s426_s7 = inlined_call_operand.vmem [shape: f32[8,2], index: 7, kind: output, shape index: {}]  }
   0x1   :  { %291 = vmatprep.subr.bf16.mxu0 %v332_v0  ;;  %v323_v1 = vld [vmem:[%s419_s1] sm:$0xff]   ;;  %297 = vmatprep.mubr.msk.bf16.mxu0 %vm333_vm0, %v332_v0  ;;  %v324_v2 = vld [vmem:[%s419_s1 + $0x8] sm:$0xff]   ;;  %v325_v3 = vld [vmem:[%s419_s1 + $0x10] ss:$0 sps:$4 sm:$0xff]   ;;  %vm145_vm3 = vcmask 523264   ;;  %vm214_vm4 = vcmask 261120  }
   0x2   :  { %301 = vmatprep.subr.bf16.mxu1 %v332_v0  ;;  %309 = vmatprep.mubr.msk.bf16.mxu1 %vm333_vm0, %v332_v0  ;;  %v326_v4 = vld [vmem:[%s420_s3] sm:$0xff]   ;;  %v327_v5 = vld [vmem:[%s420_s3 + $0x8] sm:$0xff]   ;;  %v62_v7 = vsel %vm60_vm1, %v325_v3, 0  ;;  %v328_v9 = vld [vmem:[%s420_s3 + $0x10] sm:$0xff]   ;;  %vm258_vm5 = vcmask 15360  }
   0x3   :  { %292 = vmatpush3.bf16.msra.mxu0 %v323_v1  ;;  %302 = vmatpush3.bf16.msra.mxu1 %v326_v4  ;;  %v27_v6 = vld [vmem:[%s421_s0] sm:$0xff]  ;;  %v329_v10 = vld [vmem:[%s420_s3 + $0x18] sm:$0xff]   ;;  %v331_v20 = vld [vmem:[%s422_s5 + $0x8] sm:$0xff]  }
   0x4   :  { %293 = vmatprep.subr.bf16.mxu0 %v332_v0  ;;  %303 = vmatprep.subr.bf16.mxu1 %v332_v0  ;;  %v28_v8 = vpack.c.bf16 %v27_v6, %v27_v6  ;;  %v330_v11 = vld [vmem:[%s422_s5] sm:$0xff]  }
   0x5   :  { %v264_v12 = vld [vmem:[%s423_s2] ss:$0 sm:$0xff] }
   0x6   :  { %v269_v21 = vld [vmem:[%s424_s4] ss:$0 sm:$0xff] }
   0x7   :  { %294 = vmatpush3.bf16.msra.mxu0 %v324_v2  ;;  %304 = vmatpush3.bf16.msra.mxu1 %v327_v5  ;;  %v275_v29 = vld [vmem:[%s425_s6] ss:$0 sm:$0xff] }
   0x8   :  { %295 = vmatprep.subr.bf16.mxu0 %v332_v0  ;;  %305 = vmatprep.subr.bf16.mxu1 %v332_v0 }
   0xb   :  { %296 = vmatpush3.bf16.msra.mxu0 %v62_v7  ;;  %306 = vmatpush3.bf16.msra.mxu1 %v328_v9 }
   0xc   :  { %313 = vmatprep.subr.bf16.mxu0 %v332_v0  ;;  %307 = vmatprep.subr.bf16.mxu1 %v332_v0 }
   0xe   :  { %298 = vmatmul.mubr.msk.bf16.vlgmr.msra.gmra.mrb[0].mxu0 %vm56_vm2, %v28_v8 }
   0xf   :  { %317 = vmatprep.mubr.msk.bf16.mxu0 %vm333_vm0, %v332_v0  ;;  %308 = vmatpush3.bf16.msra.mxu1 %v329_v10 }
  0x10   :  { %314 = vmatpush3.bf16.msra.mxu0 %v330_v11 }
  0x11   :  { %315 = vmatprep.subr.bf16.mxu0 %v332_v0 }
  0x14   :  { %316 = vmatpush3.bf16.msra.mxu0 %v331_v20 }
  0xe1   :  { %v98_v13 = vpop.f32.mrb[0].mxu0 }
  0xe2   :  { %v99_v14 = vadd.f32 %v264_v12, %v98_v13  ;;  %v299_v15 = vpop.f32.mrb[1].mxu0 }
  0xe3   :  { %v101_v16 = vpop.f32.mrb[2].mxu0 }
  0xe4   :  { %v104_v17 = vmax.f32 %v99_v14, 0.0  ;;  %v300_v18 = vpop.f32.mrb[3].mxu0 }
  0xe6   :  { %v105_v19 = vpack.c.bf16 %v104_v17, %v104_v17 }
  0xe8   :  { %310 = vmatmul.mubr.msk.bf16.vlgmr.msra.gmra.mrb[0].mxu1 %vm145_vm3, %v105_v19 }
 0x1bb   :  { %v183_v22 = vpop.f32.mrb[0].mxu1 }
 0x1bc   :  { %v184_v23 = vadd.f32 %v269_v21, %v183_v22  ;;  %v311_v24 = vpop.f32.mrb[1].mxu1 }
 0x1bd   :  { %v186_v25 = vpop.f32.mrb[2].mxu1 }
 0x1be   :  { %v189_v26 = vmax.f32 %v184_v23, 0.0  ;;  %v312_v27 = vpop.f32.mrb[3].mxu1 }
 0x1c0   :  { %v190_v28 = vpack.c.bf16 %v189_v26, %v189_v26 }
 0x1c2   :  { %318 = vmatmul.mubr.msk.bf16.vlgmr.msra.gmra.mrb[4].mxu0 %vm214_vm4, %v190_v28 }
 0x295   :  { %v252_v30 = vpop.f32.mrb[4].mxu0 }
 0x296   :  { %v253_v31 = vadd.f32 %v275_v29, %v252_v30  ;;  %v319_v32 = vpop.f32.mrb[5].mxu0 }
 0x297   :  { %v255_v33 = vpop.f32.mrb[6].mxu0 }
 0x298   :  { %259 = vst.msk [vmem:[%s426_s7] sm:$0xff] %vm258_vm5, %v253_v31  ;;  %v320_v34 = vpop.f32.mrb[7].mxu0 }

</bundles_post_ra>
